<compile_context>
chip_gen: v7x
topology: tpu7x:2x2x1
jax: 0.10.0
libtpu: 0.0.40
codegen_flags: <defaults>
</compile_context>

<pallas_src>
import functools

import jax
import jax.numpy as jnp
from jax.experimental import pallas as pl
from jax.experimental.pallas import tpu as pltpu

LANES = 128
SUBLANES = 8
BLOCK_ROWS_MAX = 4096     # 4096 x 128 x 4B = 2 MiB per input tile
NUM_SPLITS = 2            # row-range split across TensorCores (v7x megacore)


def _round_up(x, m):
    return ((x + m - 1) // m) * m


def _weighted_loss_kernel(x_ref, y_ref, o_ref, acc_abs, acc_sq,
                          *, block_rows, blocks_per_split, rows):
    c = pl.program_id(0)          # core / split index ("parallel")
    i = pl.program_id(1)          # row-block index within split ("arbitrary")

    @pl.when(i == 0)
    def _():
        acc_abs[...] = jnp.zeros_like(acc_abs)
        acc_sq[...] = jnp.zeros_like(acc_sq)

    # Logical (unclamped) row-block index handled by this grid step.
    gb = c * blocks_per_split + i

    d = x_ref[...].astype(jnp.float32) - y_ref[...].astype(jnp.float32)

    def _accumulate(dd):
        # (block_rows, 128) -> (block_rows//8, 8, 128); reduce over the
        # leading axis = pure vreg-wise VPU adds, accumulator stays (8,128).
        d3 = dd.reshape(block_rows // SUBLANES, SUBLANES, LANES)
        acc_abs[...] += jnp.sum(jnp.abs(d3), axis=0)
        acc_sq[...] += jnp.sum(d3 * d3, axis=0)

    is_full = (gb + 1) * block_rows <= rows

    @pl.when(is_full)
    def _():
        _accumulate(d)

    @pl.when(jnp.logical_not(is_full))
    def _():
        # Ragged / out-of-range tail tile: zero out rows beyond the array.
        row_ids = gb * block_rows + jax.lax.broadcasted_iota(
            jnp.int32, (block_rows, LANES), 0)
        _accumulate(jnp.where(row_ids < rows, d, 0.0))

    @pl.when(i == pl.num_programs(1) - 1)
    def _():
        o_ref[0, 0] = acc_abs[...]
        o_ref[0, 1] = acc_sq[...]


def weighted_loss(x, y, weights=(0.8, 0.2)):
    """WeightedLoss([L1Loss(), MSELoss()], weights) forward pass.

    x, y: NCHW arrays of identical shape (any float dtype).  Returns a
    float32 scalar: weights[0]*mean(|x-y|) + weights[1]*mean((x-y)^2).
    """
    assert x.shape == y.shape
    n_elems = x.size
    w_l1, w_mse = (float(w) for w in weights)

    # preprocess = Identity (no-op).  Flatten NCHW -> (rows, 128) lane-dense
    # slab; the reshape is layout-preserving (no HBM copy) when the element
    # count is a lane multiple.
    flat_x = x.reshape(-1)
    flat_y = y.reshape(-1)
    if n_elems % LANES != 0:
        # TODO(synk): rare lane-remainder path costs one extra HBM copy; the
        # zero padding contributes 0 to both |d| and d^2 and we divide by the
        # true element count, so the result is unchanged.
        pad = LANES - (n_elems % LANES)
        flat_x = jnp.pad(flat_x, (0, pad))
        flat_y = jnp.pad(flat_y, (0, pad))
    rows = flat_x.size // LANES
    x2 = flat_x.reshape(rows, LANES)
    y2 = flat_y.reshape(rows, LANES)

    block_rows = min(BLOCK_ROWS_MAX, _round_up(rows, SUBLANES))
    total_blocks = pl.cdiv(rows, block_rows)
    blocks_per_split = pl.cdiv(total_blocks, NUM_SPLITS)

    def in_map(c, i):
        # Clamp so duplicated trailing steps re-read a valid block; their
        # contribution is masked to zero inside the kernel.
        gb = jnp.minimum(c * blocks_per_split + i, total_blocks - 1)
        return (gb, 0)

    kernel = functools.partial(
        _weighted_loss_kernel,
        block_rows=block_rows,
        blocks_per_split=blocks_per_split,
        rows=rows)

    partials = pl.pallas_call(
        kernel,
        out_shape=jax.ShapeDtypeStruct(
            (NUM_SPLITS, 2, SUBLANES, LANES), jnp.float32),
        grid_spec=pltpu.PrefetchScalarGridSpec(
            num_scalar_prefetch=0,
            grid=(NUM_SPLITS, blocks_per_split),
            in_specs=[
                pl.BlockSpec((block_rows, LANES), in_map),
                pl.BlockSpec((block_rows, LANES), in_map),
            ],
            out_specs=pl.BlockSpec((1, 2, SUBLANES, LANES),
                                   lambda c, i: (c, 0, 0, 0)),
            scratch_shapes=[
                pltpu.VMEM((SUBLANES, LANES), jnp.float32),  # sum |x - y|
                pltpu.VMEM((SUBLANES, LANES), jnp.float32),  # sum (x - y)^2
            ],
        ),
        compiler_params=pltpu.CompilerParams(
            dimension_semantics=("parallel", "arbitrary")),
    )(x2, y2)

    # Tiny final combine (2*2*8*128 floats): cross-split sum, weights, 1/N.
    sum_abs = jnp.sum(partials[:, 0])
    sum_sq = jnp.sum(partials[:, 1])
    inv_n = 1.0 / float(n_elems)
    return (w_l1 * sum_abs + w_mse * sum_sq) * inv_n


def weighted_loss_ref(x, y, weights=(0.8, 0.2)):
    x = x.astype(jnp.float32)
    y = y.astype(jnp.float32)
    d = x - y
    return weights[0] * jnp.mean(jnp.abs(d)) + weights[1] * jnp.mean(d * d)


if __name__ == "__main__":
    key = jax.random.PRNGKey(0)
    kx, ky = jax.random.split(key)
    # Small NCHW inputs consistent with an image-loss use case.
    x = jax.random.normal(kx, (2, 4, 16, 16), dtype=jnp.float32)
    y = jax.random.normal(ky, (2, 4, 16, 16), dtype=jnp.float32)

    out = weighted_loss(x, y)
    out = jax.block_until_ready(out)

    ref = weighted_loss_ref(x, y)
    assert jnp.allclose(out, ref, rtol=1e-5, atol=1e-5), (out, ref)
    print("KERNEL_OK")
</pallas_src>

<mosaic_0001>
module attributes {stable_mosaic.version = 11 : i64} {
  func.func @_weighted_loss_kernel(%arg0: i32, %arg1: i32, %arg2: memref<16x128xf32, #tpu.memory_space<vmem>>, %arg3: memref<16x128xf32, #tpu.memory_space<vmem>>, %arg4: memref<1x2x8x128xf32, #tpu.memory_space<vmem>>, %arg5: memref<8x128xf32, #tpu.memory_space<vmem>>, %arg6: memref<8x128xf32, #tpu.memory_space<vmem>>) attributes {dimension_semantics = [#tpu.dimension_semantics<parallel>, #tpu.dimension_semantics<arbitrary>], iteration_bounds = array<i64: 2, 1>, scalar_prefetch = 0 : i64, scratch_operands = 2 : i64, tpu.core_type = #tpu.core_type<tc>, window_params = [{transform_indices = @transform_0, window_bounds = array<i64: 16, 128>}, {transform_indices = @transform_1, window_bounds = array<i64: 16, 128>}, {transform_indices = @transform_2, window_bounds = array<i64: 1, 2, 8, 128>}]} {
    %c0_i32 = arith.constant 0 : i32
    %0 = arith.cmpi eq, %arg1, %c0_i32 : i32
    %1 = arith.extui %0 : i1 to i32
    %c0_i32_0 = arith.constant 0 : i32
    %2 = arith.cmpi ne, %1, %c0_i32_0 : i32
    scf.if %2 {
      %cst = arith.constant 0.000000e+00 : f32
      %19 = vector.broadcast %cst : f32 to vector<8x128xf32>
      %c0_10 = arith.constant 0 : index
      %c0_11 = arith.constant 0 : index
      %20 = vector.load %arg5[%c0_10, %c0_11] : memref<8x128xf32, #tpu.memory_space<vmem>>, vector<8x128xf32>
      tpu.vector_store %arg5[%c0_10, %c0_11], %19 {strides = array<i32>} : memref<8x128xf32, #tpu.memory_space<vmem>>, vector<8x128xf32>,
      %cst_12 = arith.constant 0.000000e+00 : f32
      %21 = vector.broadcast %cst_12 : f32 to vector<8x128xf32>
      %c0_13 = arith.constant 0 : index
      %c0_14 = arith.constant 0 : index
      %22 = vector.load %arg6[%c0_13, %c0_14] : memref<8x128xf32, #tpu.memory_space<vmem>>, vector<8x128xf32>
      tpu.vector_store %arg6[%c0_13, %c0_14], %21 {strides = array<i32>} : memref<8x128xf32, #tpu.memory_space<vmem>>, vector<8x128xf32>,
    } else {
    }
    %c1_i32 = arith.constant 1 : i32
    %3 = arith.muli %arg0, %c1_i32 : i32
    %4 = arith.addi %3, %arg1 : i32
    %c0 = arith.constant 0 : index
    %c0_1 = arith.constant 0 : index
    %5 = vector.load %arg2[%c0, %c0_1] : memref<16x128xf32, #tpu.memory_space<vmem>>, vector<16x128xf32>
    %c0_2 = arith.constant 0 : index
    %c0_3 = arith.constant 0 : index
    %6 = vector.load %arg3[%c0_2, %c0_3] : memref<16x128xf32, #tpu.memory_space<vmem>>, vector<16x128xf32>
    %7 = arith.subf %5, %6 : vector<16x128xf32>
    %c1_i32_4 = arith.constant 1 : i32
    %8 = arith.addi %4, %c1_i32_4 : i32
    %c16_i32 = arith.constant 16 : i32
    %9 = arith.muli %8, %c16_i32 : i32
    %c16_i32_5 = arith.constant 16 : i32
    %10 = arith.cmpi sle, %9, %c16_i32_5 : i32
    %11 = arith.extui %10 : i1 to i32
    %c0_i32_6 = arith.constant 0 : i32
    %12 = arith.cmpi ne, %11, %c0_i32_6 : i32
    scf.if %12 {
      %19 = vector.shape_cast %7 : vector<16x128xf32> to vector<2x8x128xf32>
      %c0_10 = arith.constant 0 : index
      %c0_11 = arith.constant 0 : index
      %20 = vector.load %arg5[%c0_10, %c0_11] : memref<8x128xf32, #tpu.memory_space<vmem>>, vector<8x128xf32>
      %21 = math.absf %19 : vector<2x8x128xf32>
      %cst = arith.constant dense<0.000000e+00> : vector<8x128xf32>
      %22 = vector.multi_reduction <add>, %21, %cst [0] : vector<2x8x128xf32> to vector<8x128xf32>
      %23 = arith.addf %20, %22 : vector<8x128xf32>
      %c0_12 = arith.constant 0 : index
      %c0_13 = arith.constant 0 : index
      %24 = vector.load %arg5[%c0_12, %c0_13] : memref<8x128xf32, #tpu.memory_space<vmem>>, vector<8x128xf32>
      tpu.vector_store %arg5[%c0_12, %c0_13], %23 {strides = array<i32>} : memref<8x128xf32, #tpu.memory_space<vmem>>, vector<8x128xf32>,
      %c0_14 = arith.constant 0 : index
      %c0_15 = arith.constant 0 : index
      %25 = vector.load %arg6[%c0_14, %c0_15] : memref<8x128xf32, #tpu.memory_space<vmem>>, vector<8x128xf32>
      %26 = arith.mulf %19, %19 : vector<2x8x128xf32>
      %cst_16 = arith.constant dense<0.000000e+00> : vector<8x128xf32>
      %27 = vector.multi_reduction <add>, %26, %cst_16 [0] : vector<2x8x128xf32> to vector<8x128xf32>
      %28 = arith.addf %25, %27 : vector<8x128xf32>
      %c0_17 = arith.constant 0 : index
      %c0_18 = arith.constant 0 : index
      %29 = vector.load %arg6[%c0_17, %c0_18] : memref<8x128xf32, #tpu.memory_space<vmem>>, vector<8x128xf32>
      tpu.vector_store %arg6[%c0_17, %c0_18], %28 {strides = array<i32>} : memref<8x128xf32, #tpu.memory_space<vmem>>, vector<8x128xf32>,
    } else {
    }
    %true = arith.constant true
    %13 = arith.xori %10, %true : i1
    %14 = arith.extui %13 : i1 to i32
    %c0_i32_7 = arith.constant 0 : i32
    %15 = arith.cmpi ne, %14, %c0_i32_7 : i32
    scf.if %15 {
      %c16_i32_10 = arith.constant 16 : i32
      %19 = arith.muli %4, %c16_i32_10 : i32
      %20 = tpu.iota {dimensions = array<i32: 0>} : vector<16x128xi32>
      %21 = vector.broadcast %19 : i32 to vector<16x128xi32>
      %22 = arith.addi %21, %20 : vector<16x128xi32>
      %c16_i32_11 = arith.constant 16 : i32
      %23 = vector.broadcast %c16_i32_11 : i32 to vector<16x128xi32>
      %24 = arith.cmpi slt, %22, %23 : vector<16x128xi32>
      %cst = arith.constant 0.000000e+00 : f32
      %25 = vector.broadcast %cst : f32 to vector<16x128xf32>
      %26 = arith.select %24, %7, %25 : vector<16x128xi1>, vector<16x128xf32>
      %27 = vector.shape_cast %26 : vector<16x128xf32> to vector<2x8x128xf32>
      %c0_12 = arith.constant 0 : index
      %c0_13 = arith.constant 0 : index
      %28 = vector.load %arg5[%c0_12, %c0_13] : memref<8x128xf32, #tpu.memory_space<vmem>>, vector<8x128xf32>
      %29 = math.absf %27 : vector<2x8x128xf32>
      %cst_14 = arith.constant dense<0.000000e+00> : vector<8x128xf32>
      %30 = vector.multi_reduction <add>, %29, %cst_14 [0] : vector<2x8x128xf32> to vector<8x128xf32>
      %31 = arith.addf %28, %30 : vector<8x128xf32>
      %c0_15 = arith.constant 0 : index
      %c0_16 = arith.constant 0 : index
      %32 = vector.load %arg5[%c0_15, %c0_16] : memref<8x128xf32, #tpu.memory_space<vmem>>, vector<8x128xf32>
      tpu.vector_store %arg5[%c0_15, %c0_16], %31 {strides = array<i32>} : memref<8x128xf32, #tpu.memory_space<vmem>>, vector<8x128xf32>,
      %c0_17 = arith.constant 0 : index
      %c0_18 = arith.constant 0 : index
      %33 = vector.load %arg6[%c0_17, %c0_18] : memref<8x128xf32, #tpu.memory_space<vmem>>, vector<8x128xf32>
      %34 = arith.mulf %27, %27 : vector<2x8x128xf32>
      %cst_19 = arith.constant dense<0.000000e+00> : vector<8x128xf32>
      %35 = vector.multi_reduction <add>, %34, %cst_19 [0] : vector<2x8x128xf32> to vector<8x128xf32>
      %36 = arith.addf %33, %35 : vector<8x128xf32>
      %c0_20 = arith.constant 0 : index
      %c0_21 = arith.constant 0 : index
      %37 = vector.load %arg6[%c0_20, %c0_21] : memref<8x128xf32, #tpu.memory_space<vmem>>, vector<8x128xf32>
      tpu.vector_store %arg6[%c0_20, %c0_21], %36 {strides = array<i32>} : memref<8x128xf32, #tpu.memory_space<vmem>>, vector<8x128xf32>,
    } else {
    }
    %c0_i32_8 = arith.constant 0 : i32
    %16 = arith.cmpi eq, %arg1, %c0_i32_8 : i32
    %17 = arith.extui %16 : i1 to i32
    %c0_i32_9 = arith.constant 0 : i32
    %18 = arith.cmpi ne, %17, %c0_i32_9 : i32
    scf.if %18 {
      %c0_10 = arith.constant 0 : index
      %c0_11 = arith.constant 0 : index
      %19 = vector.load %arg5[%c0_10, %c0_11] : memref<8x128xf32, #tpu.memory_space<vmem>>, vector<8x128xf32>
      %c0_12 = arith.constant 0 : index
      %c0_13 = arith.constant 0 : index
      %c0_14 = arith.constant 0 : index
      %c0_15 = arith.constant 0 : index
      %20 = vector.load %arg4[%c0_12, %c0_13, %c0_14, %c0_15] : memref<1x2x8x128xf32, #tpu.memory_space<vmem>>, vector<1x1x8x128xf32>
      %21 = vector.shape_cast %20 : vector<1x1x8x128xf32> to vector<8x128xf32>
      %22 = vector.shape_cast %19 : vector<8x128xf32> to vector<1x1x8x128xf32>
      tpu.vector_store %arg4[%c0_12, %c0_13, %c0_14, %c0_15], %22 {strides = array<i32>} : memref<1x2x8x128xf32, #tpu.memory_space<vmem>>, vector<1x1x8x128xf32>,
      %c0_16 = arith.constant 0 : index
      %c0_17 = arith.constant 0 : index
      %23 = vector.load %arg6[%c0_16, %c0_17] : memref<8x128xf32, #tpu.memory_space<vmem>>, vector<8x128xf32>
      %c0_18 = arith.constant 0 : index
      %c1 = arith.constant 1 : index
      %c0_19 = arith.constant 0 : index
      %c0_20 = arith.constant 0 : index
      %24 = vector.load %arg4[%c0_18, %c1, %c0_19, %c0_20] : memref<1x2x8x128xf32, #tpu.memory_space<vmem>>, vector<1x1x8x128xf32>
      %25 = vector.shape_cast %24 : vector<1x1x8x128xf32> to vector<8x128xf32>
      %26 = vector.shape_cast %23 : vector<8x128xf32> to vector<1x1x8x128xf32>
      tpu.vector_store %arg4[%c0_18, %c1, %c0_19, %c0_20], %26 {strides = array<i32>} : memref<1x2x8x128xf32, #tpu.memory_space<vmem>>, vector<1x1x8x128xf32>,
    } else {
    }
    return
  }
  func.func @transform_0(%arg0: i32, %arg1: i32) -> (i32, i32) {
    %c1_i32 = arith.constant 1 : i32
    %0 = arith.muli %arg0, %c1_i32 : i32
    %1 = arith.addi %0, %arg1 : i32
    %c0_i32 = arith.constant 0 : i32
    %2 = arith.minsi %1, %c0_i32 : i32
    %c0_i32_0 = arith.constant 0 : i32
    %c0_i32_1 = arith.constant 0 : i32
    return %2, %c0_i32_0 : i32, i32
  }
  func.func @transform_1(%arg0: i32, %arg1: i32) -> (i32, i32) {
    %c1_i32 = arith.constant 1 : i32
    %0 = arith.muli %arg0, %c1_i32 : i32
    %1 = arith.addi %0, %arg1 : i32
    %c0_i32 = arith.constant 0 : i32
    %2 = arith.minsi %1, %c0_i32 : i32
    %c0_i32_0 = arith.constant 0 : i32
    %c0_i32_1 = arith.constant 0 : i32
    return %2, %c0_i32_0 : i32, i32
  }
  func.func @transform_2(%arg0: i32, %arg1: i32) -> (i32, i32, i32, i32) {
    %c0_i32 = arith.constant 0 : i32
    %c0_i32_0 = arith.constant 0 : i32
    %c0_i32_1 = arith.constant 0 : i32
    %c0_i32_2 = arith.constant 0 : i32
    return %arg0, %c0_i32, %c0_i32_0, %c0_i32_1 : i32, i32, i32, i32
  }
}

</mosaic_0001>

<bundles_post_ra>
// kernel: tpu_custom_call.1
= control target key start
LH: loop header
LB: loop body
LE: loop exit
PB: predicated region body
PF: predicated region fallthrough
CT: control target
= control target key end

     0   :  { %7 = vsyncpa [#allocation5], 0  ;;  %s961_s0 = inlined_call_operand.hbm [shape: f32[16,128], index: 0, kind: input, shape index: {}]   ;;  %s962_s1 = inlined_call_operand.hbm [shape: f32[16,128], index: 1, kind: input, shape index: {}]   ;;  %s963_s2 = inlined_call_operand.hbm [shape: f32[2,2,8,128], index: 2, kind: output, shape index: {}]  }
   0x1   :  { %9 = vsyncpa [#allocation5 + $0x1], 0 }
   0x2   :  { %10 = vsyncpa [#allocation8], 0 }
   0x3   :  { %12 = vsyncpa [#allocation8 + $0x1], 0 }
   0x4   :  { %13 = vsyncpa [#allocation6], 0 }
   0x5   :  { %15 = vsyncpa [#allocation6 + $0x1], 0  ;;  %s741_s9 = smov 0   ;;  %s743_s10 = smov 0  }
   0x6   :  { %s745_s11 = smov 0   ;;  %s747_s12 = smov 0  }
   0x7   :  { %s749_s13 = smov 0   ;;  %s751_s14 = smov 0  }
   0x8   :  { %s753_s15 = smov 0   ;;  %s755_s16 = smov 0  }
   0x9 LB: > { %s424_s17 = sadd.s32 4294967295, %s716_s16   ;;  %s425_s18 = sadd.s32 4294967294, %s716_s16   ;;  %s716_s16 = sphi %s755_s16, %s21_s16   ;;  %s712_s15 = sphi %s753_s15, %s982_s15   ;;  %s708_s14 = sphi %s751_s14, %s981_s14   ;;  %s704_s13 = sphi %s749_s13, %s951_s13   ;;  %s700_s12 = sphi %s747_s12, %s980_s12   ;;  %s696_s11 = sphi %s745_s11, %s979_s11   ;;  %s692_s10 = sphi %s743_s10, %s978_s10   ;;  %s688_s9 = sphi %s741_s9, %s977_s9  }
   0xa   : > { %s33_s19 = sadd.s32 1, %s712_s15  ;;  %p685_p1 = scmp.ne.s32.totalorder %s704_s13, 0 }
   0xb   : > { %p35_p0 = scmp.ge.s32.totalorder %s33_s19, 2  ;;  %p54_p2 = scmp.eq.s32.totalorder %s716_s16, 0 }
   0xc   : > { %p59_p3 = scmp.ne.s32.totalorder %s704_s13, %s700_s12  ;;  %p60_p5 = scmp.eq.s32.totalorder %s424_s17, 0 }
   0xd   : > { %s984_s19 = smov (%p35_p0, %s33_s19), 0  ;;  %p787_p4 = por %p685_p1, %p54_p2 }
   0xe   : > { %p791_p6 = por %p60_p5, %p59_p3  ;;  %s101_s22 = ssub.s32 %s712_s15, %s984_s19 }
   0xf   : > { %p102_p7 = scmp.eq.s32.totalorder %s101_s22, 0  ;;  %s104_s23 = sadd.s32 1, %s696_s11 }
  0x10   : > { %s967_s21 = scalar_select %p791_p6, 1, 0 }
  0x11   : > { %s799_s24 = scalar_select %p102_p7, %s696_s11, %s104_s23  }
  0x12   : > { %p114_p8 = scmp.ne.s32.totalorder %s696_s11, %s692_s10  ;;  %p115_p9 = scmp.eq.s32.totalorder %s424_s17, 1 }
  0x13   : > { %p120_p10 = scmp.ne.s32.totalorder %s692_s10, %s688_s9  ;;  %p121_p11 = scmp.eq.s32.totalorder %s425_s18, 1 }
  0x14   : > { %p805_p12 = por %p115_p9, %p114_p8  ;;  %p470_p1 = scmp.lt.s32.totalorder %s716_s16, 2 }
  0x15   : > { %p810_p0 = por %p121_p11, %p120_p10  ;;  %s718_s27 = smov [#allocation4]  }
  0x16   : > { %s968_s25 = scalar_select %p805_p12, 1, 0 }
  0x17   : > { %s969_s26 = scalar_select %p810_p0, 1, 0 }
  0x18   : > { %s155_s28 = sshll.u32 %s718_s27, 4  ;;  %p817_p2 = pnand %p470_p1, %p787_p4  ;;  %s156_s28 = int_to_ptr.vmem [resolvable:$true] %s155_s28 }
  0x19   : > { %s549_s4 = scalar_lea.hbm %s961_s0, 256 }
  0x1a   : > { %p550_p3 = scmp.ne.s32.totalorder %s961_s0, %s549_s4  ;;  %p551_p5 = pneg %p817_p2 }
  0x1b   : > { %p556_p8 = scmp.lt.u32.totalorder %s549_s4, %s549_s4  ;;  %p558_p9 = scmp.lt.u32.totalorder %s549_s4, %s961_s0 }
  0x1c   : > { %p552_p7 = pnand %p551_p5, %p550_p3 }
  0x1d   : > { %p559_p10 = por %p558_p9, %p556_p8 }
  0x1e   : > { %p553_p4 = pneg %p552_p7 }
  0x20   : > { %p560_p11 = pnand %p559_p10, %p553_p4 }
  0x22   : > { %563 = shalt.err (!%p560_p11)
}
  0x23   : > { %s564_s12 = scalar_lea.vmem %s156_s28, 256  ;;  %s571_s17 = scalar_lea.vmem %s156_s28, 512 }
  0x24   : > { %p565_p1 = scmp.ne.s32.totalorder %s156_s28, %s564_s12  ;;  %p572_p12 = scmp.lt.s32.totalorder %s156_s28, %s156_s28 }
  0x25   : > { %p573_p6 = scmp.lt.s32.totalorder %s571_s17, %s564_s12 }
  0x26   : > { %p567_p13 = pnand %p565_p1, %p551_p5 }
  0x27   : > { %p574_p3 = por %p573_p6, %p572_p12 }
  0x28   : > { %p568_p0 = pneg %p567_p13 }
  0x2a   : > { %p575_p7 = pnand %p574_p3, %p568_p0 }
  0x2c   : > { %578 = shalt.err (!%p575_p7)
}
  0x2d   : > { %s719_s18 = smov 128   ;;  %s720_s20 = smov 8  }
  0x2e   : > { %462 = dma.hbm_to_vmem [thread:$0]  (!%p817_p2), %s961_s0, 256, %s156_s28, [#allocation5], %s719_s18, %s719_s18, %s720_s20  }
  0x2f   : > { %p434_p13 = scmp.ge.s32.totalorder %s716_s16, 1  ;;  %p187_p4 = scmp.lt.s32.totalorder %s716_s16, 3 }
  0x30   : > { %s721_s30 = smov [#allocation7]   ;;  %s579_s6 = scalar_lea.hbm %s962_s1, 256 }
  0x31   : > { %p848_p8 = pnand %p434_p13, %p187_p4  ;;  %s179_s3 = sshll.u32 %s721_s30, 4  ;;  %s180_s3 = int_to_ptr.vmem [resolvable:$true] %s179_s3 }
  0x32   : > { %p580_p6 = scmp.ne.s32.totalorder %s962_s1, %s579_s6  ;;  %p586_p9 = scmp.lt.u32.totalorder %s579_s6, %s579_s6 }
  0x33   : > { %s971_s27 = scalar_select %p848_p8, 1, 0 }
  0x34   : > { %p582_p12 = pnand %p580_p6, %p551_p5  ;;  %p588_p10 = scmp.lt.u32.totalorder %s579_s6, %s962_s1 }
  0x36   : > { %p583_p0 = pneg %p582_p12  ;;  %p589_p11 = por %p588_p10, %p586_p9 }
  0x38   : > { %p590_p1 = pnand %p589_p11, %p583_p0 }
  0x3a   : > { %593 = shalt.err (!%p590_p1)
}
  0x3b   : > { %s594_s17 = scalar_lea.vmem %s180_s3, 256  ;;  %s601_s22 = scalar_lea.vmem %s180_s3, 512 }
  0x3c   : > { %p595_p3 = scmp.ne.s32.totalorder %s180_s3, %s594_s17  ;;  %p602_p4 = scmp.lt.s32.totalorder %s180_s3, %s180_s3 }
  0x3d   : > { %p603_p8 = scmp.lt.s32.totalorder %s601_s22, %s594_s17 }
  0x3e   : > { %p597_p7 = pnand %p595_p3, %p551_p5 }
  0x3f   : > { %p604_p6 = por %p603_p8, %p602_p4 }
  0x40   : > { %p598_p13 = pneg %p597_p7 }
  0x42   : > { %p605_p12 = pnand %p604_p6, %p598_p13 }
  0x44   : > { %608 = shalt.err (!%p605_p12)
}
  0x45   : > { %465 = dma.hbm_to_vmem [thread:$0]  (!%p817_p2), %s962_s1, 256, %s180_s3, [#allocation8], %s719_s18, %s719_s18, %s720_s20  }
  0x46   : > { %p972_p0 = scmp.ne.s32.totalorder %s971_s27, 0 }
  0x47   : > { %s193_s4 = sand.u32 (!%p972_p0), 1, %s704_s13   ;;  %p973_p5 = scmp.ne.s32.totalorder (!%p972_p0), %s967_s21, 0 }
  0x48   : > { %191 = sbr.rel (%p972_p0) target bundleno = 138 (0x8a), region = 28  ;;  %s435_s5 = sshll.u32 (!%p972_p0), %s193_s4, 4 }
  0x49   : > { %s194_s6 = scalar_lea.sflag (!%p972_p0), [#allocation5], %s193_s4  ;;  %s197_s7 = scalar_lea.vmem (!%p972_p0), [#allocation4], %s435_s5 }
  0x4f   : > { %674 = dma.done.wait (%p973_p5), %s194_s6, 256  }
  0x50   : > { %676 = vsyncadd (%p973_p5), %s194_s6, 4294967040  ;;  %s203_s29 = scalar_lea.sflag [#allocation8], %s193_s4  ;;  %s206_s8 = scalar_lea.vmem [#allocation7], %s435_s5 }
  0x51   : > { %678 = dma.done.wait (%p973_p5), %s203_s29, 256  }
  0x52   : > { %680 = vsyncadd (%p973_p5), %s203_s29, 4294967040  ;;  %s229_s18 = sand.u32 1, %s692_s10   ;;  %s450_s20 = sshll.u32 %s708_s14, 4  ;;  %v722_v0 = vmov 0.0   ;;  %v247_v1 = vld [vmem:[%s197_s7] sm:$0xff]  ;;  %v248_v2 = vld [vmem:[%s197_s7 + $0x8] sm:$0xff] }
  0x53   : > { %s437_s27 = sshll.u32 %s229_s18, 4  ;;  %244 = vst [vmem:[#allocation2] sm:$0xff] %v722_v0  ;;  %245 = vst [vmem:[#allocation3] sm:$0xff] %v722_v0  ;;  %s451_s3 = sadd.s32 16, %s450_s20  ;;  %v249_v3 = vld [vmem:[%s206_s8] sm:$0xff]  ;;  %v250_v4 = vld [vmem:[%s206_s8 + $0x8] sm:$0xff] }
  0x54   : > { %v251_v5 = vsub.f32 %v247_v1, %v249_v3  ;;  %v252_v6 = vsub.f32 %v248_v2, %v250_v4  ;;  %s892_s21 = scalar_lea.vmem [#allocation9], %s437_s27  ;;  %p439_p2 = scmp.gt.s32.totalorder %s451_s3, 16 }
  0x56   : > { %258 = sbr.rel (%p439_p2) target bundleno = 94 (0x5e), region = 44  ;;  %v260_v7 = vand.u32 (!%p439_p2), 2147483647, %v251_v5  ;;  %v261_v8 = vand.u32 (!%p439_p2), 2147483647, %v252_v6  ;;  %v266_v9 = vmul.f32 (!%p439_p2), %v251_v5, %v251_v5  ;;  %v267_v10 = vmul.f32 (!%p439_p2), %v252_v6, %v252_v6 }
  0x58   : > { %v262_v13 = vadd.f32 (!%p439_p2), %v261_v8, %v260_v7  ;;  %v268_v14 = vadd.f32 (!%p439_p2), %v267_v10, %v266_v9 }
  0x5a   : > { %v259_v11 = vld [vmem:[#allocation2] sm:$0xff] (!%p439_p2)  ;;  %v265_v12 = vld [vmem:[#allocation3] sm:$0xff] (!%p439_p2) }
  0x5b   : > { %v263_v15 = vadd.f32 (!%p439_p2), %v262_v13, %v259_v11  ;;  %v269_v16 = vadd.f32 (!%p439_p2), %v268_v14, %v265_v12 }
  0x5d   : > { %264 = vst [vmem:[#allocation2] sm:$0xff] %v263_v15  ;;  %270 = vst [vmem:[#allocation3] sm:$0xff] %v269_v16 }
  0x5e PF: > { %p440_p8 = scmp.le.s32.totalorder %s451_s3, 16 }
  0x5f   : > { %v276_v17 = vlaneseq (!%p440_p8)  ;;  %v279_v18 = vstv (!%p440_p8), %s450_s20 }
  0x60   : > { %274 = sbr.rel (%p440_p8) target bundleno = 112 (0x70), region = 48 }
  0x61   : > { %v277_v19 = vshrl.u32 (!%p440_p8), %v276_v17, 7 }
  0x63   : > { %v278_v20 = vadd.s32 (!%p440_p8), 8, %v277_v19  ;;  %v280_v21 = vadd.s32 (!%p440_p8), %v279_v18, %v277_v19 }
  0x64   : > { %v286_v29 = vld [vmem:[#allocation2] sm:$0xff] (!%p440_p8)  ;;  %v292_v30 = vld [vmem:[#allocation3] sm:$0xff] (!%p440_p8) }
  0x65   : > { %v281_v22 = vadd.s32 (!%p440_p8), %v279_v18, %v278_v20  ;;  %vm282_vm0 = vcmp.lt.s32.totalorder (!%p440_p8), %v280_v21, 16 }
  0x66   : > { %v284_v23 = vsel (!%p440_p8), %vm282_vm0, %v251_v5, 0.0 }
  0x67   : > { %vm283_vm1 = vcmp.lt.s32.totalorder %v281_v22, 16  ;;  %v287_v24 = vand.u32 2147483647, %v284_v23  ;;  %v293_v25 = vmul.f32 %v284_v23, %v284_v23 }
  0x68   : > { %v285_v26 = vsel %vm283_vm1, %v252_v6, 0.0 }
  0x69   : > { %v288_v27 = vand.u32 2147483647, %v285_v26  ;;  %v294_v28 = vmul.f32 %v285_v26, %v285_v26 }
  0x6b   : > { %v289_v31 = vadd.f32 %v288_v27, %v287_v24  ;;  %v295_v32 = vadd.f32 %v294_v28, %v293_v25 }
  0x6d   : > { %v290_v33 = vadd.f32 %v289_v31, %v286_v29  ;;  %v296_v34 = vadd.f32 %v295_v32, %v292_v30 }
  0x6f   : > { %291 = vst [vmem:[#allocation2] sm:$0xff] %v290_v33  ;;  %297 = vst [vmem:[#allocation3] sm:$0xff] %v296_v34 }
  0x70 PF: > { %s452_s28 = sshll.u32 %s708_s14, 8  ;;  %s320_s23 = sshll.u32 %s892_s21, 4  ;;  %s905_s23 = int_to_ptr.vmem [resolvable:$true] %s320_s23 }
  0x71   : > { %s902_s22 = scalar_lea.hbm %s963_s2, %s452_s28  ;;  %s909_s30 = scalar_lea.sflag [#allocation6], %s229_s18 }
  0x72   : > { %s609_s4 = scalar_lea.vmem %s905_s23, 256  ;;  %p974_p10 = scmp.ne.s32.totalorder %s968_s25, 0 }
  0x73   : > { %p610_p9 = scmp.ne.s32.totalorder %s905_s23, %s609_s4  ;;  %s723_s14 = smov [#allocation9]  }
  0x74   : > { %s613_s5 = sshll.u32 %s723_s14, 4  ;;  %s614_s5 = int_to_ptr.vmem [resolvable:$false] %s613_s5 }
  0x75   : > { %p611_p11 = pnand %p610_p9, %p974_p10  ;;  %s615_s6 = scalar_lea.vmem %s614_s5, 512 }
  0x76   : > { %v301_v35 = vld [vmem:[#allocation2] sm:$0xff]  ;;  %v303_v36 = vld [vmem:[#allocation3] sm:$0xff]  ;;  %p616_p3 = scmp.lt.s32.totalorder %s905_s23, %s614_s5  ;;  %p617_p7 = scmp.lt.s32.totalorder %s615_s6, %s609_s4 }
  0x77   : > { %302 = vst [vmem:[%s892_s21] sm:$0xff] %v301_v35  ;;  %442 = vst [vmem:[%s892_s21 + $0x8] sm:$0xff] %v303_v36  ;;  %p612_p1 = pneg %p611_p11 }
  0x78   : > { %p618_p13 = por %p617_p7, %p616_p3 }
  0x7a   : > { %p619_p4 = pnand %p618_p13, %p612_p1 }
  0x7c   : > { %622 = shalt.err (!%p619_p4)
}
  0x7d   : > { %s623_s7 = scalar_lea.hbm %s902_s22, 256  ;;  %s627_s18 = scalar_lea.hbm %s963_s2, 512 }
  0x7e   : > { %p624_p6 = scmp.ne.s32.totalorder %s902_s22, %s623_s7  ;;  %p628_p5 = scmp.lt.u32.totalorder %s902_s22, %s963_s2 }
  0x7f   : > { %p629_p2 = scmp.lt.u32.totalorder %s627_s18, %s623_s7  ;;  %p631_p9 = scmp.lt.u32.totalorder %s623_s7, %s902_s22 }
  0x80   : > { %p625_p12 = pnand %p624_p6, %p974_p10 }
  0x81   : > { %p630_p8 = por %p629_p2, %p628_p5 }
  0x82   : > { %p626_p0 = pneg %p625_p12 }
  0x83   : > { %p632_p11 = por %p631_p9, %p630_p8 }
  0x85   : > { %p633_p1 = pnand %p632_p11, %p626_p0 }
  0x87   : > { %636 = shalt.err (!%p633_p1)
}
  0x88   : > { %s724_s3 = smov 128   ;;  %s725_s21 = smov 8  }
  0x89   : > { %457 = dma.vmem_to_hbm [thread:$0]  (%p974_p10), %s905_s23, 256, %s902_s22, %s909_s30, %s724_s3, %s724_s3, %s725_s21  }
  0x8a PF: > { %s335_s28 = sand.u32 1, %s688_s9   ;;  %p975_p3 = scmp.ne.s32.totalorder %s969_s26, 0 }
  0x8b   : > { %p976_p7 = scmp.ge.s32.totalorder %s716_s16, 2  ;;  %s336_s12 = scalar_lea.sflag [#allocation6], %s335_s28 }
  0x8d   : > { %p467_p13 = pnand %p976_p7, %p975_p3 }
  0x8f   : > { %682 = dma.done.wait (!%p467_p13), %s336_s12, 256  }
  0x90   : > { %684 = vsyncadd (!%p467_p13), %s336_s12, 4294967040  ;;  %s21_s16 = sadd.s32 1, %s716_s16   ;;  %s977_s9 = smov %s692_s10 }
  0x91   : > { %p18_p4 = scmp.ge.s32.totalorder %s21_s16, 4   ;;  %s978_s10 = smov %s696_s11 }
  0x92   : > { %s979_s11 = smov %s799_s24  ;;  %s980_s12 = smov %s704_s13 }
  0x93   : > { %s951_s13 = smov 0   ;;  %s981_s14 = smov %s712_s15 }
  0x94   : > { %s982_s15 = smov %s984_s19  ;;  %20 = sbr.rel (!%p18_p4) target bundleno = 9 (0x9), region = 103 }
  0x9b   :  { %341 = vsyncpa [#allocation5], 1 }
  0x9c   :  { %343 = vsyncpa [#allocation5 + $0x1], 1 }
  0x9d   :  { %344 = vsyncpa [#allocation8], 1 }
  0x9e   :  { %346 = vsyncpa [#allocation8 + $0x1], 1 }
  0x9f   :  { %347 = vsyncpa [#allocation6], 1 }
  0xa0   :  { %349 = vsyncpa [#allocation6 + $0x1], 1 }

</bundles_post_ra>
